<compile_context>
chip_gen: v5e
topology: v5e:2x2
jax: 0.10.0
libtpu: 0.0.40
codegen_flags: <defaults>
</compile_context>

<pallas_src>
import functools

import jax
import jax.numpy as jnp
from jax.experimental import pallas as pl
from jax.experimental.pallas import tpu as pltpu


def _ceil_div(a, b):
    return -(-a // b)


def _round_up(v, m):
    return ((v + m - 1) // m) * m


def _conv_norm_kernel(x_ref, w_ref, b_ref, g_ref, beta_ref, o_ref, cols_ref, *,
                      bb, c_in, c_out, ksize, stride, pad, l_in, l_out,
                      l_out_p, eps):
    # x_ref   : (1, bb*C_in, L)        sublane-dense input block (bb samples)
    # w_ref   : (C_out, K*C_in)        tap-major flattened conv weight
    # b_ref   : (C_out, 1)             conv bias
    # g_ref   : (C_out, 1)             GroupNorm affine scale
    # beta_ref: (C_out, 1)             GroupNorm affine shift
    # o_ref   : (1, bb*C_out, L_out_p) lane-dense output block
    # cols_ref: (K*C_in, bb*L_out_p)   persistent im2col scratch (VMEM)
    xv = x_ref[0]                                   # native dtype for the MXU
    w = w_ref[...]
    bias = b_ref[...].astype(jnp.float32)           # (C_out, 1)

    # Hoisted broadcasts (JAX does not CSE broadcast_in_dim).
    g_full = jnp.broadcast_to(g_ref[...].astype(jnp.float32), (c_out, l_out_p))
    be_full = jnp.broadcast_to(beta_ref[...].astype(jnp.float32),
                               (c_out, l_out_p))

    # Zero the im2col scratch (halo lanes + padded output lanes must be zero).
    # Done every step on purpose — see header comment about "parallel" + 2 TCs.
    cols_ref[...] = jnp.zeros_like(cols_ref)

    # im2col via sliced stores: row block kk*C_in:(kk+1)*C_in of `cols` holds
    # tap kk; sample b occupies lanes [b*L_out_p, (b+1)*L_out_p).  Tap stores
    # are clamped to output columns j < L_out, so lanes [L_out, L_out_p) stay
    # zero and the corresponding conv output is exactly `bias`.
    for b in range(bb):
        xb = xv[b * c_in:(b + 1) * c_in, :]          # (C_in, L)
        base = b * l_out_p
        for kk in range(ksize):
            j_lo = max(0, _ceil_div(pad - kk, stride))
            j_hi = min(l_out, (l_in - 1 + pad - kk) // stride + 1)
            dlen = j_hi - j_lo
            if dlen <= 0:
                continue
            src_lo = j_lo * stride + kk - pad
            if stride == 1:
                tap = xb[:, src_lo:src_lo + dlen]
            else:
                # TODO(synk): wrapper-side stride de-interleave would avoid
                # this lane-strided (XLU) read.
                tap = xb[:, src_lo:src_lo + (dlen - 1) * stride + 1:stride]
            cols_ref[kk * c_in:(kk + 1) * c_in, base + j_lo:base + j_hi] = tap

    # One MXU contraction of depth K*C_in over all bb samples, f32 accumulation.
    y = jnp.dot(w, cols_ref[...], preferred_element_type=jnp.float32) + bias

    # GroupNorm(num_groups=1): per-sample single-pass sum / sum-of-squares over
    # the valid (C_out, L_out) window.  Padded lanes contribute exactly `bias`,
    # removed with scalar corrections (no full-size mask/select).
    n_pad = l_out_p - l_out
    inv_cnt = 1.0 / float(c_out * l_out)
    if n_pad:
        corr1 = float(n_pad) * jnp.sum(bias)
        corr2 = float(n_pad) * jnp.sum(bias * bias)
    else:
        corr1 = jnp.float32(0.0)
        corr2 = jnp.float32(0.0)

    for b in range(bb):
        yb = y[:, b * l_out_p:(b + 1) * l_out_p]     # 128-aligned lane slice
        s1 = jnp.sum(yb) - corr1
        s2 = jnp.sum(yb * yb) - corr2
        mean = s1 * inv_cnt
        var = jnp.maximum(s2 * inv_cnt - mean * mean, 0.0)
        inv = jax.lax.rsqrt(var + eps)
        o_ref[0, b * c_out:(b + 1) * c_out, :] = (
            (yb - mean) * inv * g_full + be_full).astype(o_ref.dtype)


def _vmem_capacity_bytes():
    try:
        return int(pltpu.get_tpu_info().vmem_capacity_bytes)
    except Exception:
        return 64 << 20     # conservative (v7x-sized) fallback


def conv_norm(x, weight, bias, gamma, beta, *, stride=1, eps=1e-8,
              batch_block=None):
    """Fused Conv1d + GroupNorm(1, C_out) forward. x: (N, C_in, L)."""
    n, c_in, length = x.shape
    c_out, c_in_w, k = weight.shape
    assert c_in_w == c_in, "groups > 1 not supported"  # TODO(synk): grouped conv
    pad = (k - 1) // 2
    l_out = (length + 2 * pad - k) // stride + 1
    l_out_p = _round_up(l_out, 128)                    # lane-dense output width
    isz = x.dtype.itemsize

    # --- generation-aware VMEM budget and samples-per-step (bb) selection ---
    cap = int(0.72 * _vmem_capacity_bytes())           # ~92 MiB on 128 MiB parts,
                                                       # ~46 MiB on 64 MiB parts
    def footprint(bb):
        in_b = 2 * _round_up(bb * c_in, 8) * _round_up(length, 128) * isz
        out_b = 2 * _round_up(bb * c_out, 8) * l_out_p * isz
        col_b = _round_up(k * c_in, 8) * bb * l_out_p * isz
        y_b = _round_up(c_out, 8) * bb * l_out_p * 4
        epi_b = 2 * _round_up(c_out, 8) * l_out_p * 4
        w_b = _round_up(c_out, 8) * _round_up(k * c_in, 128) * isz \
            + 3 * _round_up(c_out, 8) * 128 * 4
        return int(1.25 * (in_b + out_b + col_b + y_b + epi_b + w_b))

    bb_cap = max(1, batch_block) if batch_block is not None else 32
    bb = 1
    for cand in range(1, n + 1):
        if cand > bb_cap:
            break
        if n % cand:
            continue
        if n >= 2 and n // cand < 2:     # keep >= 2 grid steps (v7x has 2 TCs)
            continue
        if footprint(cand) > cap:
            continue
        bb = cand
    grid = n // bb
    # TODO(synk): for prime N the divisor search degrades to bb=1.

    # Weight flattened tap-major: w2[o, kk*C_in + c] == weight[o, c, kk].
    w2 = jnp.transpose(weight, (0, 2, 1)).reshape(c_out, k * c_in).astype(x.dtype)
    b2 = bias.reshape(c_out, 1)
    g2 = gamma.reshape(c_out, 1)
    be2 = beta.reshape(c_out, 1)

    # Free, contiguous reshape: bb samples folded onto the sublane axis so
    # small C_in doesn't waste sublanes / DMA granularity.
    xr = x.reshape(grid, bb * c_in, length)

    kernel = functools.partial(_conv_norm_kernel, bb=bb, c_in=c_in, c_out=c_out,
                               ksize=k, stride=stride, pad=pad, l_in=length,
                               l_out=l_out, l_out_p=l_out_p, eps=eps)

    vmem_limit = int(min(cap, max(2 * footprint(bb), 32 << 20)))

    out = pl.pallas_call(
        kernel,
        out_shape=jax.ShapeDtypeStruct((grid, bb * c_out, l_out_p), x.dtype),
        grid_spec=pltpu.PrefetchScalarGridSpec(
            num_scalar_prefetch=0,
            grid=(grid,),
            in_specs=[
                pl.BlockSpec((1, bb * c_in, length), lambda i: (i, 0, 0)),
                pl.BlockSpec((c_out, k * c_in), lambda i: (0, 0)),
                pl.BlockSpec((c_out, 1), lambda i: (0, 0)),
                pl.BlockSpec((c_out, 1), lambda i: (0, 0)),
                pl.BlockSpec((c_out, 1), lambda i: (0, 0)),
            ],
            out_specs=pl.BlockSpec((1, bb * c_out, l_out_p),
                                   lambda i: (i, 0, 0)),
            scratch_shapes=[pltpu.VMEM((k * c_in, bb * l_out_p), x.dtype)],
        ),
        compiler_params=pltpu.CompilerParams(
            dimension_semantics=("parallel",),
            vmem_limit_bytes=vmem_limit),
    )(xr, w2, b2, g2, be2)

    out = out.reshape(n, c_out, l_out_p)
    if l_out_p != l_out:
        out = out[:, :, :l_out]
    return out


def _reference(x, weight, bias, gamma, beta, *, stride=1, eps=1e-8):
    """Pure-JAX reference (lax conv + manual groupnorm) for validation."""
    pad = (weight.shape[-1] - 1) // 2
    y = jax.lax.conv_general_dilated(
        x, weight, window_strides=(stride,), padding=[(pad, pad)],
        dimension_numbers=("NCH", "OIH", "NCH"))
    y = y + bias[None, :, None]
    mean = jnp.mean(y, axis=(1, 2), keepdims=True)
    var = jnp.mean((y - mean) ** 2, axis=(1, 2), keepdims=True)
    y = (y - mean) * jax.lax.rsqrt(var + eps)
    return y * gamma[None, :, None] + beta[None, :, None]


def _run_case(key, n, c_in, c_out, k, length, tol):
    kx, kw, kb = jax.random.split(key, 3)
    x = jax.random.normal(kx, (n, c_in, length), dtype=jnp.float32)
    bound = 1.0 / (c_in * k) ** 0.5
    weight = jax.random.uniform(kw, (c_out, c_in, k), jnp.float32,
                                minval=-bound, maxval=bound)
    bias = jax.random.uniform(kb, (c_out,), jnp.float32,
                              minval=-bound, maxval=bound)
    gamma = jnp.ones((c_out,), jnp.float32)   # GroupNorm affine init (weight=1)
    beta = jnp.zeros((c_out,), jnp.float32)   # GroupNorm affine init (bias=0)

    out = conv_norm(x, weight, bias, gamma, beta, stride=1, eps=1e-8)
    out = jax.block_until_ready(out)
    ref = _reference(x, weight, bias, gamma, beta, stride=1, eps=1e-8)
    pad = (k - 1) // 2
    l_out = (length + 2 * pad - k) + 1
    assert out.shape == (n, c_out, l_out)
    assert jnp.max(jnp.abs(out - ref)) < tol
    return out


if __name__ == "__main__":
    key = jax.random.PRNGKey(0)
    k1, k2 = jax.random.split(key)

    # Shapes consistent with ConvNorm(nIn=4, nOut=8, kSize=3), batch=2, L=16.
    _run_case(k1, n=2, c_in=4, c_out=8, k=3, length=16, tol=1e-3)
    # Slightly larger case exercising bb>1 batching and padded-lane correction.
    _run_case(k2, n=4, c_in=6, c_out=16, k=5, length=200, tol=1e-3)

    print("KERNEL_OK")
</pallas_src>

<mosaic_0001>
module attributes {stable_mosaic.version = 11 : i64} {
  func.func @_conv_norm_kernel(%arg0: i32, %arg1: memref<1x4x16xf32, #tpu.memory_space<vmem>>, %arg2: memref<8x12xf32, #tpu.memory_space<vmem>>, %arg3: memref<8x1xf32, #tpu.memory_space<vmem>>, %arg4: memref<8x1xf32, #tpu.memory_space<vmem>>, %arg5: memref<8x1xf32, #tpu.memory_space<vmem>>, %arg6: memref<1x8x128xf32, #tpu.memory_space<vmem>>, %arg7: memref<12x128xf32, #tpu.memory_space<vmem>>) attributes {dimension_semantics = [#tpu.dimension_semantics<parallel>], iteration_bounds = array<i64: 2>, scalar_prefetch = 0 : i64, scratch_operands = 1 : i64, tpu.core_type = #tpu.core_type<tc>, window_params = [{transform_indices = @transform_0, window_bounds = array<i64: 1, 4, 16>}, {pipeline_mode = #tpu.pipeline_mode<synchronous>, transform_indices = @transform_1, window_bounds = array<i64: 8, 12>}, {pipeline_mode = #tpu.pipeline_mode<synchronous>, transform_indices = @transform_2, window_bounds = array<i64: 8, 1>}, {pipeline_mode = #tpu.pipeline_mode<synchronous>, transform_indices = @transform_3, window_bounds = array<i64: 8, 1>}, {pipeline_mode = #tpu.pipeline_mode<synchronous>, transform_indices = @transform_4, window_bounds = array<i64: 8, 1>}, {transform_indices = @transform_5, window_bounds = array<i64: 1, 8, 128>}]} {
    %c0 = arith.constant 0 : index
    %c0_0 = arith.constant 0 : index
    %c0_1 = arith.constant 0 : index
    %0 = vector.load %arg1[%c0, %c0_0, %c0_1] : memref<1x4x16xf32, #tpu.memory_space<vmem>>, vector<1x4x16xf32>
    %1 = vector.shape_cast %0 : vector<1x4x16xf32> to vector<4x16xf32>
    %c0_2 = arith.constant 0 : index
    %c0_3 = arith.constant 0 : index
    %2 = vector.load %arg2[%c0_2, %c0_3] : memref<8x12xf32, #tpu.memory_space<vmem>>, vector<8x12xf32>
    %c0_4 = arith.constant 0 : index
    %c0_5 = arith.constant 0 : index
    %3 = vector.load %arg3[%c0_4, %c0_5] : memref<8x1xf32, #tpu.memory_space<vmem>>, vector<8x1xf32>
    %c0_6 = arith.constant 0 : index
    %c0_7 = arith.constant 0 : index
    %4 = vector.load %arg4[%c0_6, %c0_7] : memref<8x1xf32, #tpu.memory_space<vmem>>, vector<8x1xf32>
    %5 = vector.shape_cast %4 : vector<8x1xf32> to vector<8x1xf32>
    %6 = vector.broadcast %5 : vector<8x1xf32> to vector<8x128xf32>
    %c0_8 = arith.constant 0 : index
    %c0_9 = arith.constant 0 : index
    %7 = vector.load %arg5[%c0_8, %c0_9] : memref<8x1xf32, #tpu.memory_space<vmem>>, vector<8x1xf32>
    %8 = vector.shape_cast %7 : vector<8x1xf32> to vector<8x1xf32>
    %9 = vector.broadcast %8 : vector<8x1xf32> to vector<8x128xf32>
    %cst = arith.constant 0.000000e+00 : f32
    %10 = vector.broadcast %cst : f32 to vector<12x128xf32>
    %c0_10 = arith.constant 0 : index
    %c0_11 = arith.constant 0 : index
    %11 = vector.load %arg7[%c0_10, %c0_11] : memref<12x128xf32, #tpu.memory_space<vmem>>, vector<12x128xf32>
    tpu.vector_store %arg7[%c0_10, %c0_11], %10 {strides = array<i32>} : memref<12x128xf32, #tpu.memory_space<vmem>>, vector<12x128xf32>,
    %12 = vector.extract_strided_slice %1 {offsets = [0, 0], sizes = [4, 15], strides = [1, 1]} : vector<4x16xf32> to vector<4x15xf32>
    %c0_12 = arith.constant 0 : index
    %c1 = arith.constant 1 : index
    %13 = vector.load %arg7[%c0_12, %c1] : memref<12x128xf32, #tpu.memory_space<vmem>>, vector<4x15xf32>
    tpu.vector_store %arg7[%c0_12, %c1], %12 {strides = array<i32>} : memref<12x128xf32, #tpu.memory_space<vmem>>, vector<4x15xf32>,
    %c4 = arith.constant 4 : index
    %c0_13 = arith.constant 0 : index
    %14 = vector.load %arg7[%c4, %c0_13] : memref<12x128xf32, #tpu.memory_space<vmem>>, vector<4x16xf32>
    tpu.vector_store %arg7[%c4, %c0_13], %1 {strides = array<i32>} : memref<12x128xf32, #tpu.memory_space<vmem>>, vector<4x16xf32>,
    %15 = vector.extract_strided_slice %1 {offsets = [0, 1], sizes = [4, 15], strides = [1, 1]} : vector<4x16xf32> to vector<4x15xf32>
    %c8 = arith.constant 8 : index
    %c0_14 = arith.constant 0 : index
    %16 = vector.load %arg7[%c8, %c0_14] : memref<12x128xf32, #tpu.memory_space<vmem>>, vector<4x15xf32>
    tpu.vector_store %arg7[%c8, %c0_14], %15 {strides = array<i32>} : memref<12x128xf32, #tpu.memory_space<vmem>>, vector<4x15xf32>,
    %c0_15 = arith.constant 0 : index
    %c0_16 = arith.constant 0 : index
    %17 = vector.load %arg7[%c0_15, %c0_16] : memref<12x128xf32, #tpu.memory_space<vmem>>, vector<12x128xf32>
    %cst_17 = arith.constant dense<0.000000e+00> : vector<8x128xf32>
    %18 = tpu.matmul %2, %17, %cst_17 {dimension_numbers = #tpu.dot_dimension_numbers<[1], [0], [0], [1], [0, 0, 1, 1], [], []>} : vector<8x12xf32>, vector<12x128xf32>, vector<8x128xf32> -> vector<8x128xf32>
    %19 = vector.broadcast %3 : vector<8x1xf32> to vector<8x128xf32>
    %20 = arith.addf %18, %19 : vector<8x128xf32>
    %21 = vector.shape_cast %3 : vector<8x1xf32> to vector<1x8x1xf32>
    %cst_18 = arith.constant dense<0.000000e+00> : vector<1xf32>
    %22 = vector.multi_reduction <add>, %21, %cst_18 [1, 2] : vector<1x8x1xf32> to vector<1xf32>
    %23 = vector.shape_cast %22 : vector<1xf32> to vector<1x1x1xf32>
    %24 = vector.extract %23[0, 0, 0] : f32 from vector<1x1x1xf32>
    %cst_19 = arith.constant 1.120000e+02 : f32
    %25 = arith.mulf %cst_19, %24 : f32
    %26 = arith.mulf %3, %3 : vector<8x1xf32>
    %27 = vector.shape_cast %26 : vector<8x1xf32> to vector<1x8x1xf32>
    %cst_20 = arith.constant dense<0.000000e+00> : vector<1xf32>
    %28 = vector.multi_reduction <add>, %27, %cst_20 [1, 2] : vector<1x8x1xf32> to vector<1xf32>
    %29 = vector.shape_cast %28 : vector<1xf32> to vector<1x1x1xf32>
    %30 = vector.extract %29[0, 0, 0] : f32 from vector<1x1x1xf32>
    %cst_21 = arith.constant 1.120000e+02 : f32
    %31 = arith.mulf %cst_21, %30 : f32
    %32 = vector.shape_cast %20 : vector<8x128xf32> to vector<1x8x128xf32>
    %cst_22 = arith.constant dense<0.000000e+00> : vector<1xf32>
    %33 = vector.multi_reduction <add>, %32, %cst_22 [1, 2] : vector<1x8x128xf32> to vector<1xf32>
    %34 = vector.shape_cast %33 : vector<1xf32> to vector<1x1x1xf32>
    %35 = vector.extract %34[0, 0, 0] : f32 from vector<1x1x1xf32>
    %36 = arith.subf %35, %25 : f32
    %37 = arith.mulf %20, %20 : vector<8x128xf32>
    %38 = vector.shape_cast %37 : vector<8x128xf32> to vector<1x8x128xf32>
    %cst_23 = arith.constant dense<0.000000e+00> : vector<1xf32>
    %39 = vector.multi_reduction <add>, %38, %cst_23 [1, 2] : vector<1x8x128xf32> to vector<1xf32>
    %40 = vector.shape_cast %39 : vector<1xf32> to vector<1x1x1xf32>
    %41 = vector.extract %40[0, 0, 0] : f32 from vector<1x1x1xf32>
    %42 = arith.subf %41, %31 : f32
    %cst_24 = arith.constant 7.812500e-03 : f32
    %43 = arith.mulf %36, %cst_24 : f32
    %cst_25 = arith.constant 7.812500e-03 : f32
    %44 = arith.mulf %42, %cst_25 : f32
    %45 = arith.mulf %43, %43 : f32
    %46 = arith.subf %44, %45 : f32
    %cst_26 = arith.constant 0.000000e+00 : f32
    %47 = arith.maximumf %46, %cst_26 : f32
    %cst_27 = arith.constant 9.99999993E-9 : f32
    %48 = arith.addf %47, %cst_27 : f32
    %49 = math.rsqrt %48 : f32
    %50 = vector.broadcast %43 : f32 to vector<8x128xf32>
    %51 = arith.subf %20, %50 : vector<8x128xf32>
    %52 = vector.broadcast %49 : f32 to vector<8x128xf32>
    %53 = arith.mulf %51, %52 : vector<8x128xf32>
    %54 = arith.mulf %53, %6 : vector<8x128xf32>
    %55 = arith.addf %54, %9 : vector<8x128xf32>
    %c0_28 = arith.constant 0 : index
    %c0_29 = arith.constant 0 : index
    %c0_30 = arith.constant 0 : index
    %56 = vector.load %arg6[%c0_28, %c0_29, %c0_30] : memref<1x8x128xf32, #tpu.memory_space<vmem>>, vector<1x8x128xf32>
    %57 = vector.shape_cast %56 : vector<1x8x128xf32> to vector<8x128xf32>
    %58 = vector.shape_cast %55 : vector<8x128xf32> to vector<1x8x128xf32>
    tpu.vector_store %arg6[%c0_28, %c0_29, %c0_30], %58 {strides = array<i32>} : memref<1x8x128xf32, #tpu.memory_space<vmem>>, vector<1x8x128xf32>,
    return
  }
  func.func @transform_0(%arg0: i32) -> (i32, i32, i32) {
    %c0_i32 = arith.constant 0 : i32
    %c0_i32_0 = arith.constant 0 : i32
    %c0_i32_1 = arith.constant 0 : i32
    return %arg0, %c0_i32, %c0_i32_0 : i32, i32, i32
  }
  func.func @transform_1(%arg0: i32) -> (i32, i32) {
    %c0_i32 = arith.constant 0 : i32
    %c0_i32_0 = arith.constant 0 : i32
    %c0_i32_1 = arith.constant 0 : i32
    return %c0_i32, %c0_i32_0 : i32, i32
  }
  func.func @transform_2(%arg0: i32) -> (i32, i32) {
    %c0_i32 = arith.constant 0 : i32
    %c0_i32_0 = arith.constant 0 : i32
    %c0_i32_1 = arith.constant 0 : i32
    return %c0_i32, %c0_i32_0 : i32, i32
  }
  func.func @transform_3(%arg0: i32) -> (i32, i32) {
    %c0_i32 = arith.constant 0 : i32
    %c0_i32_0 = arith.constant 0 : i32
    %c0_i32_1 = arith.constant 0 : i32
    return %c0_i32, %c0_i32_0 : i32, i32
  }
  func.func @transform_4(%arg0: i32) -> (i32, i32) {
    %c0_i32 = arith.constant 0 : i32
    %c0_i32_0 = arith.constant 0 : i32
    %c0_i32_1 = arith.constant 0 : i32
    return %c0_i32, %c0_i32_0 : i32, i32
  }
  func.func @transform_5(%arg0: i32) -> (i32, i32, i32) {
    %c0_i32 = arith.constant 0 : i32
    %c0_i32_0 = arith.constant 0 : i32
    %c0_i32_1 = arith.constant 0 : i32
    return %arg0, %c0_i32, %c0_i32_0 : i32, i32, i32
  }
}

</mosaic_0001>

<bundles_post_ra>
// kernel: tpu_custom_call.1
= control target key start
LH: loop header
LB: loop body
LE: loop exit
PB: predicated region body
PF: predicated region fallthrough
CT: control target
= control target key end

     0   :  { %10 = vsyncpa [#allocation4], 0  ;;  %s705_s0 = inlined_call_operand.vmem [shape: f32[2,4,16], index: 0, kind: input, shape index: {}]   ;;  %s706_s1 = inlined_call_operand.vmem [shape: f32[8,12], index: 1, kind: input, shape index: {}]   ;;  %s707_s2 = inlined_call_operand.vmem [shape: f32[8,1], index: 2, kind: input, shape index: {}]   ;;  %s708_s3 = inlined_call_operand.vmem [shape: f32[8,1], index: 3, kind: input, shape index: {}]   ;;  %s709_s4 = inlined_call_operand.vmem [shape: f32[8,1], index: 4, kind: input, shape index: {}]   ;;  %s710_s5 = inlined_call_operand.hbm [shape: f32[2,8,128], index: 5, kind: output, shape index: {}]  }
   0x1   :  { %12 = vsyncpa [#allocation4 + $0x1], 0  ;;  %s600_s18 = smov 0   ;;  %s602_s19 = smov 0  }
   0x2   :  { %s604_s20 = smov 0   ;;  %s606_s21 = smov 0  }
   0x3 LB: > { %s621_s22 = sadd.s32 4294967295, %s563_s21   ;;  %s430_s23 = sadd.s32 4294967294, %s563_s21   ;;  %s563_s21 = sphi %s606_s21, %s716_s21   ;;  %s559_s20 = sphi %s604_s20, %s715_s20   ;;  %s555_s19 = sphi %s602_s19, %s714_s19   ;;  %s551_s18 = sphi %s600_s18, %s713_s18  }
   0x4   : > { %s625_s24 = sadd.s32 1, %s563_s21   ;;  %s135_s25 = sadd.s32 1, %s559_s20 }
   0x5   : > { %s132_s26 = ssub.s32 %s563_s21, %s625_s24  ;;  %p145_p0 = scmp.ne.s32.totalorder %s559_s20, %s555_s19 }
   0x6   : > { %p133_p1 = scmp.eq.s32.totalorder %s132_s26, 0  ;;  %p146_p2 = scmp.eq.s32.totalorder %s621_s22, 1 }
   0x7   : > { %p151_p3 = scmp.ne.s32.totalorder %s555_s19, %s551_s18  ;;  %p152_p4 = scmp.eq.s32.totalorder %s430_s23, 1 }
   0x8   : > { %s636_s27 = scalar_select %p133_p1, %s559_s20, %s135_s25  }
   0x9   : > { %p638_p5 = por %p146_p2, %p145_p0  ;;  %p642_p6 = por %p152_p4, %p151_p3 }
   0xa   : > { %p433_p7 = scmp.ge.s32.totalorder %s563_s21, 1  ;;  %p189_p8 = scmp.lt.s32.totalorder %s563_s21, 3 }
   0xc   : > { %p190_p9 = pnand %p433_p7, %p189_p8 }
   0xd   : > { %p216_p10 = scmp.lt.s32.totalorder (!%p190_p9), %s621_s22, 1  ;;  %s566_s10 = smov (!%p190_p9), 127  }
   0xe   : > { %193 = sbr.rel (%p190_p9) target bundleno = 553 (0x229), region = 40  ;;  %s567_s11 = smov (!%p190_p9), 1  }
   0xf   : > { %s569_s16 = smov (!%p190_p9), 0.0   ;;  %s213_s25 = sand.u32 (!%p190_p9), 1, %s555_s19  }
  0x13   : > { %v565_v0 = vmov 0.0   ;;  %s217_s30 = scalar_select %p216_p10, %s621_s22, 1  ;;  %vm243_vm0 = vcmask 125952   ;;  %v222_v2 = vld [vmem:[%s707_s2] sm:$0xff]  ;;  %vm285_vm1 = vcmask 7168   ;;  %v568_v3 = vmov 0  }
  0x14   : > { %235 = vst [vmem:[#allocation2] sm:$0xff] %v565_v0  ;;  %496 = vset.pattern.permute.xlu1 %v568_v3  ;;  %v297_v4 = vmul.f32 %v222_v2, %v222_v2  ;;  %497 = vset.pattern.permute.xlu2 %v568_v3  ;;  %vm248_vm2 = vcmask 117760   ;;  %vm241_vm3 = vcmask 125960   ;;  %vm261_vm4 = vcmask 1043456   ;;  %v221_v9 = vld [vmem:[%s706_s1] sm:$0xff] }
  0x15   : > { %236 = vst [vmem:[#allocation2 + $0x8] sm:$0xf] %v565_v0  ;;  %s435_s6 = sshll.u32 %s217_s30, 2  ;;  %254 = vperm.xlu1 %496, %v222_v2   ;;  %498 = vset.pattern.permute.xlu0 %v568_v3  ;;  %vm257_vm5 = vcmask 97280   ;;  %v286_v11 = vsel %vm285_vm1, %v222_v2, 0.0  ;;  %v223_v30 = vld [vmem:[%s708_s3] sm:$0xff] }
  0x16   : > { %s219_s9 = scalar_lea.vmem %s705_s0, %s435_s6  ;;  %v298_v5 = vsel %vm285_vm1, %v297_v4, 0.0  ;;  %v229_v31 = vld [vmem:[%s709_s4] sm:$0xff] }
  0x17   : > { %v220_v1 = vld [vmem:[%s219_s9] sm:$0xf]  ;;  %299 = vadd.xlane.f32.xlu2 %v298_v5 }
  0x18   : > { %245 = vrot.lane.b32.xlu0 %v220_v1, %s566_s10  ;;  %244 = vst.msk [vmem:[#allocation2 + $0x4] sm:$0xf] %vm243_vm0, %v220_v1 }
  0x20   : > { %238 = vrot.lane.b32.xlu0 %v220_v1, %s567_s11 }
  0x3f   : > { %287 = vadd.xlane.f32.xlu1 %v286_v11 }
  0x87   : > { %v255_v14 = vpop.permute.xlu1 %254 }
  0x8a   : > { %v246_v6 = vpop.permute.xlu0 %245  ;;  %v300_v12 = vpop.xlane.xlu2 %299 }
  0x8b   : > { %249 = vst.msk [vmem:[#allocation2 + $0x8] sm:$0xf] %vm248_vm2, %v246_v6  ;;  %v301_v13 = vrot.slane %v300_v12, 4 }
  0x8d   : > { %v302_v15 = vadd.f32 %v301_v13, %v300_v12 }
  0x8f   : > { %v303_v17 = vrot.slane %v302_v15, 2 }
  0x91   : > { %v304_v22 = vadd.f32 %v303_v17, %v302_v15 }
  0x92   : > { %v239_v7 = vpop.permute.xlu0 %238  ;;  %v251_v8 = vld [vmem:[#allocation2 + $0x8] sm:$0xf] }
  0x93   : > { %242 = vst.msk [vmem:[#allocation2] sm:$0xf] %vm241_vm3, %v239_v7  ;;  %436 = vmatpush.msk.msra.mxu0 %vm261_vm4, %v251_v8  ;;  %v305_v25 = vrot.slane %v304_v22, 1 }
  0x95   : > { %v306_v28 = vadd.f32 %v305_v25, %v304_v22 }
  0x9a   : > { %v250_v10 = vld [vmem:[#allocation2] sm:$0xff] }
  0x9b   : > { %280 = vmatpush.msra.mxu0 %v250_v10 }
  0x9c   : > { %437 = vmatmul.msk.f32.vlgmr.msra.gmra.mxu0 %vm257_vm5, %v221_v9 }
  0xb2   : > { %v288_v19 = vpop.xlane.xlu1 %287 }
  0xb3   : > { %v289_v21 = vrot.slane %v288_v19, 4 }
  0xb5   : > { %v290_v23 = vadd.f32 %v289_v21, %v288_v19 }
  0xb7   : > { %v291_v24 = vrot.slane %v290_v23, 2 }
  0xb9   : > { %v292_v26 = vadd.f32 %v291_v24, %v290_v23 }
  0xbb   : > { %v293_v27 = vrot.slane %v292_v26, 1 }
  0xbd   : > { %v294_v29 = vadd.f32 %v293_v27, %v292_v26 }
  0xbf   : > { %442 = vpush %v294_v29 }
  0xc0   : > { %444 = vpush %v306_v28 }
  0xf0   : > { %s443_s26 = spop %442 }
  0xf1   : > { %s445_s30 = spop %444  ;;  %s296_s6 = smul.f32 112.0, %s443_s26 }
  0xf2   : > { %s308_s8 = smul.f32 112.0, %s445_s30  ;;  %s434_s26 = sshll.u32 %s213_s25, 3 }
  0xf3   : > { %s439_s30 = sshll.u32 %s621_s22, 3  ;;  %s356_s22 = scalar_lea.sflag [#allocation4], %s213_s25 }
 0x119   : > { %v282_v16 = vpop.f32.mrf.mxu0 }
 0x11a   : > { %v661_v18 = vadd.f32 %v282_v16, %v255_v14 }
 0x11c   : > { %309 = vadd.xlane.f32.xlu2 %v661_v18  ;;  %v319_v20 = vmul.f32 %v661_v18, %v661_v18 }
 0x11e   : > { %320 = vadd.xlane.f32.xlu0 %v319_v20 }
 0x134   : > { %226 = vperm.xlu2 %497, %v223_v30  }
 0x13c   : > { %232 = vperm.xlu2 %497, %v229_v31  }
 0x18f   : > { %v310_v32 = vpop.xlane.xlu2 %309 }
 0x190   : > { %v311_v33 = vrot.slane %v310_v32, 4 }
 0x191   : > { %v321_v34 = vpop.xlane.xlu0 %320 }
 0x192   : > { %v312_v35 = vadd.f32 %v311_v33, %v310_v32  ;;  %v322_v36 = vrot.slane %v321_v34, 4 }
 0x194   : > { %v313_v37 = vrot.slane %v312_v35, 2  ;;  %v323_v38 = vadd.f32 %v322_v36, %v321_v34 }
 0x196   : > { %v324_v39 = vrot.slane %v323_v38, 2  ;;  %v314_v40 = vadd.f32 %v313_v37, %v312_v35 }
 0x197   : > { %v227_v54 = vpop.permute.xlu2 %226 }
 0x198   : > { %v325_v41 = vadd.f32 %v324_v39, %v323_v38  ;;  %v315_v42 = vrot.slane %v314_v40, 1 }
 0x19a   : > { %v316_v43 = vadd.f32 %v315_v42, %v314_v40  ;;  %v326_v44 = vrot.slane %v325_v41, 1 }
 0x19c   : > { %446 = vpush %v316_v43  ;;  %v327_v45 = vadd.f32 %v326_v44, %v325_v41 }
 0x19e   : > { %448 = vpush %v327_v45 }
 0x19f   : > { %v233_v60 = vpop.permute.xlu2 %232 }
 0x1cd   : > { %s447_s7 = spop %446 }
 0x1ce   : > { %s318_s9 = ssub.f32 %s447_s7, %s296_s6 }
 0x1cf   : > { %s449_s10 = spop %448 }
 0x1d0   : > { %s330_s11 = smul.f32 0.0078125, %s318_s9  ;;  %s329_s12 = ssub.f32 %s449_s10, %s308_s8 }
 0x1d1   : > { %s366_s9 = scalar_lea.hbm %s710_s5, %s439_s30  ;;  %s215_s10 = scalar_lea.vmem [#allocation3], %s434_s26 }
 0x1d2   : > { %s332_s13 = smul.f32 %s330_s11, %s330_s11  ;;  %v348_v55 = vstv %s330_s11 }
 0x1d3   : > { %s331_s14 = smul.f32 0.0078125, %s329_s12  ;;  %v349_v56 = vsub.f32 %v661_v18, %v348_v55  ;;  %s368_s12 = sshll.u32 %s215_s10, 4  ;;  %s369_s12 = int_to_ptr.vmem [resolvable:$true] %s368_s12 }
 0x1d5   : > { %s333_s15 = ssub.f32 %s331_s14, %s332_s13  ;;  %s370_s13 = sshll.u32 %s366_s9, 4  ;;  %s371_s13 = int_to_ptr.hbm [resolvable:$true] %s370_s13 }
 0x1d6   : > { %s515_s11 = sshra.s32 %s371_s13, 4  ;;  %s516_s11 = int_to_ptr.hbm [resolvable:$true] %s515_s11 }
 0x1d7   : > { %s334_s17 = smax.f32 %s569_s16, %s333_s15  ;;  %s517_s14 = scalar_lea.hbm %s516_s11, 8 }
 0x1d8   : > { %s335_s23 = sadd.f32 1e-08, %s334_s17  ;;  %p518_p11 = scmp.ne.s32.totalorder %s516_s11, %s517_s14 }
 0x1d9   : > { %s521_s17 = scalar_lea.hbm %s710_s5, 16  ;;  %p522_p0 = scmp.lt.s32.totalorder %s516_s11, %s710_s5 }
 0x1da   : > { %v336_v46 = vstv %s335_s23  ;;  %p519_p12 = pnand %p518_p11, %p638_p5  ;;  %p523_p1 = scmp.lt.s32.totalorder %s521_s17, %s517_s14 }
 0x1db   : > { %499 = vrsqrt.f32 %v336_v46  ;;  %vm343_vm7 = vweird.f32 %v336_v46 }
 0x1dc   : > { %p520_p13 = pneg %p519_p12  ;;  %p524_p2 = por %p523_p1, %p522_p0 }
 0x1de   : > { %p525_p3 = pnand %p524_p2, %p520_p13 }
 0x1e1   : > { %v500_v47 = vpop.eup %499 }
 0x1e2   : > { %v338_v48 = vmul.f32 %v500_v47, %v336_v46  ;;  %vm344_vm6 = vweird.f32 %v500_v47 }
 0x1e3   : > { %vm345_vm8 = vmor %vm343_vm7, %vm344_vm6 }
 0x1e4   : > { %v339_v49 = vmul.f32 %v500_v47, %v338_v48 }
 0x1e6   : > { %v340_v50 = vmul.f32 0.5, %v339_v49 }
 0x1e8   : > { %v341_v51 = vsub.f32 1.5, %v340_v50 }
 0x1ea   : > { %v342_v52 = vmul.f32 %v500_v47, %v341_v51 }
 0x1ec   : > { %v346_v53 = vsel %vm345_vm8, %v500_v47, %v342_v52 }
 0x1ed   : > { %450 = vpush %v346_v53 }
 0x21e   : > { %s451_s6 = spop %450 }
 0x21f   : > { %v350_v57 = vstv %s451_s6 }
 0x220   : > { %v351_v58 = vmul.f32 %v350_v57, %v349_v56 }
 0x222   : > { %v352_v59 = vmul.f32 %v351_v58, %v227_v54 }
 0x224   : > { %v353_v61 = vadd.f32 %v352_v59, %v233_v60 }
 0x226   : > { %354 = vst [vmem:[%s215_s10] sm:$0xff] %v353_v61 }
 0x227   : > { %528 = shalt.err (!%p525_p3)
}
 0x228   : > { %452 = dma.vmem_to_hbm [thread:$0]  (%p638_p5), %s369_s12, 128, %s371_s13, %s356_s22  }
 0x229 PF: > { %p458_p4 = scmp.ge.s32.totalorder %s563_s21, 2  ;;  %s382_s25 = sand.u32 1, %s551_s18  }
 0x22a   : > { %s383_s30 = scalar_lea.sflag [#allocation4], %s382_s25 }
 0x22b   : > { %p455_p7 = pnand %p458_p4, %p642_p6 }
 0x22d   : > { %p456_p8 = pneg %p455_p7 }
 0x22f   : > { %546 = dma.done.wait (%p456_p8), %s383_s30, 128  }
 0x230   : > { %548 = vsyncadd (%p456_p8), %s383_s30, 4294967168  ;;  %p15_p9 = scmp.ge.s32.totalorder %s625_s24, 4   ;;  %s713_s18 = smov %s555_s19 }
 0x231   : > { %s714_s19 = smov %s559_s20  ;;  %s715_s20 = smov %s636_s27 }
 0x232   : > { %s716_s21 = smov %s625_s24  ;;  %17 = sbr.rel (!%p15_p9) target bundleno = 3 (0x3), region = 75 }
 0x237   :  { %389 = vsyncpa [#allocation4], 1 }
 0x238   :  { %391 = vsyncpa [#allocation4 + $0x1], 1 }

</bundles_post_ra>
